<compile_context>
chip_gen: v5e
topology: v5e:2x2
jax: 0.10.0
libtpu: 0.0.40
codegen_flags: <defaults>
</compile_context>

<pallas_src>
import functools

import jax
import jax.numpy as jnp
from jax.experimental import pallas as pl
from jax.experimental.pallas import tpu as pltpu

_LANE = 128
_N_LIVE_TILES = 6   # 2x double-buffered input + 2x output + ~2 tiles of slack


# ---------------------------------------------------------------------------
# small helpers (padded-byte accounting, generation-aware budgets)
# ---------------------------------------------------------------------------

def _round_up(v, m):
    return (v + m - 1) // m * m


def _sublane_pack(itemsize):
    # minimum sublane multiple for a given element size (f32->8, bf16->16, i8->32)
    return max(8, 32 // max(int(itemsize), 1))


def _physical_vmem_bytes():
    try:
        info = pltpu.get_tpu_info()
        cap = getattr(info, "vmem_capacity_bytes", None)
        if cap:
            return int(cap)
    except Exception:
        pass
    return 64 * 1024 * 1024   # conservative default = v7x (smallest VMEM)


def _padded_bytes(shape, itemsize):
    """VMEM footprint of a block, with (sublane, lane) tiling padding."""
    shape = tuple(int(d) for d in shape)
    if len(shape) == 1:
        shape = (1,) + shape
    lead = 1
    for d in shape[:-2]:
        lead *= d
    sub = _round_up(shape[-2], _sublane_pack(itemsize))
    lane = _round_up(shape[-1], _LANE)
    return lead * sub * lane * int(itemsize)


def _pick_rows(B, row_bytes, tile_budget, per_buffer_cap, *, n_live, min_steps,
               multiple):
    """Pick a batch-tile row count from a padded-byte budget.

    Returns None if no legal tile fits (caller falls back / degrades)."""
    if row_bytes <= 0 or tile_budget <= 0:
        return None
    cap = int(min(tile_budget // (n_live * row_bytes),
                  per_buffer_cap // row_bytes, B))
    if cap < 1:
        return None
    # keep >= min_steps grid steps when the batch is large enough (megacore on
    # v7x + DMA/compute pipelining everywhere)
    rows = min(cap, max(1, -(-B // min_steps)))
    if multiple > 1 and rows % multiple:
        if rows >= multiple:
            rows = (rows // multiple) * multiple
        elif B <= cap:
            rows = B          # a whole-batch block is always layout-legal
        else:
            return None
    return int(max(1, rows))


# ---------------------------------------------------------------------------
# kernels
# ---------------------------------------------------------------------------

def _se1d_folded_kernel(x_ref, pool_ref, bcast_ref, w1t_ref, b1_ref, w2t_ref,
                        b2_ref, o_ref, *, inv_len, scale_activation):
    """Lane-dense variant: x block is (TB, C*L).

    Cross-lane work (pool + broadcast) is done with resident indicator
    matmuls on the otherwise-idle MXU, so every big-tile load/store stays
    lane-dense and there is no XLU lane reduction over the streamed data."""
    x = x_ref[...]                                                   # (TB, CL)

    # average pool: indicator matmul -> per-channel sums with f32 accumulate,
    # then multiply by 1/L (logical length, never the padded lane count).
    pooled = jnp.dot(x, pool_ref[...],
                     preferred_element_type=jnp.float32) * inv_len   # (TB, C)

    # fc1 + ReLU, fc2 (weights are pre-cast f32 residents)
    h = jnp.dot(pooled, w1t_ref[...],
                preferred_element_type=jnp.float32) + b1_ref[...]    # (TB, S)
    h = jnp.maximum(h, 0.0)
    z = jnp.dot(h, w2t_ref[...],
                preferred_element_type=jnp.float32) + b2_ref[...]    # (TB, C)
    scale = scale_activation(z)                                      # (TB, C)

    # broadcast scale back over the folded C*L lanes via a resident indicator
    # matmul (pure selection); the big tile stays in the input dtype.
    scale_wide = jnp.dot(scale.astype(x.dtype), bcast_ref[...],
                         preferred_element_type=jnp.float32).astype(x.dtype)
    o_ref[...] = x * scale_wide


def _se1d_ncl_kernel(x_ref, w1t_ref, b1_ref, w2t_ref, b2_ref, o_ref, *,
                     setype, inv_len, scale_activation):
    """Fallback (TB, C, L)-blocked variant (max pooling / large-L shapes)."""
    x = x_ref[...]                                                   # (TB, C, L)
    if setype == "avg":
        # sum (masked over padded lanes) * 1/logical_L
        pooled = jnp.sum(x, axis=-1, dtype=jnp.float32) * inv_len    # (TB, C)
    else:
        pooled = jnp.max(x, axis=-1).astype(jnp.float32)             # (TB, C)

    h = jnp.dot(pooled, w1t_ref[...],
                preferred_element_type=jnp.float32) + b1_ref[...]
    h = jnp.maximum(h, 0.0)
    z = jnp.dot(h, w2t_ref[...],
                preferred_element_type=jnp.float32) + b2_ref[...]
    scale = scale_activation(z)                                      # (TB, C)
    o_ref[...] = x * scale[:, :, None].astype(x.dtype)


# ---------------------------------------------------------------------------
# wrapper
# ---------------------------------------------------------------------------

def squeeze_excitation_1d(x, w1, b1, w2, b2, *, setype="avg",
                          scale_activation=jax.nn.sigmoid, block_b=None):
    """x: (B, C, L); w1: (S, C); b1: (S,); w2: (C, S); b2: (C,) (PyTorch layout)."""
    if setype not in ("avg", "max"):
        raise ValueError(f"setype must be 'avg' or 'max', got {setype!r}")

    B, C, L = x.shape
    S = w1.shape[0]
    CL = C * L
    itemsize = jnp.dtype(x.dtype).itemsize
    inv_len = 1.0 / float(L)

    # tiny FC params: pre-transpose AND pre-cast to f32 once (grid-invariant
    # residents) so the sequential grid loop never redoes the cast/transpose.
    w1t = w1.astype(jnp.float32).T          # (C, S)
    b1_2d = b1.astype(jnp.float32).reshape(1, S)
    w2t = w2.astype(jnp.float32).T          # (S, C)
    b2_2d = b2.astype(jnp.float32).reshape(1, C)

    # ---- generation-aware VMEM budget, in padded bytes ----
    phys_vmem = _physical_vmem_bytes()
    vmem_limit = int(max(24 * 1024 * 1024, min(64 * 1024 * 1024, phys_vmem * 5 // 8)))
    per_buffer_cap = (4 * 1024 * 1024 if phys_vmem <= 80 * 1024 * 1024
                      else 8 * 1024 * 1024)
    fc_resident = (_padded_bytes((C, S), 4) + _padded_bytes((1, S), 4)
                   + _padded_bytes((S, C), 4) + _padded_bytes((1, C), 4))

    # ---- lane-dense folded path (avg pooling, L < 128) ----
    if setype == "avg" and L < _LANE:
        aux_resident = (_padded_bytes((CL, C), itemsize)
                        + _padded_bytes((C, CL), itemsize))
        tile_budget = vmem_limit - fc_resident - aux_resident - (2 << 20)
        row_bytes = _round_up(CL, _LANE) * itemsize
        sub_mult = _sublane_pack(itemsize)

        if block_b is not None:
            rows = int(min(block_b, B))
        else:
            rows = _pick_rows(B, row_bytes, tile_budget, per_buffer_cap,
                              n_live=_N_LIVE_TILES, min_steps=4,
                              multiple=sub_mult)

        if rows is not None and (rows % sub_mult == 0 or rows == B):
            grid = (pl.cdiv(B, rows),)
            x_flat = x.reshape(B, CL)          # free, contiguous fold (no transpose)
            eye_c = jnp.eye(C, dtype=x.dtype)
            bcast = jnp.repeat(eye_c, L, axis=1)   # (C, C*L) indicator
            pool = bcast.T                          # (C*L, C) indicator (sum; *1/L later)

            kernel = functools.partial(_se1d_folded_kernel, inv_len=inv_len,
                                       scale_activation=scale_activation)
            cost = pl.CostEstimate(
                flops=int(4 * B * CL * C + 4 * B * C * S + B * CL),
                transcendentals=int(B * C),
                bytes_accessed=int(2 * B * CL * itemsize + aux_resident
                                   + fc_resident))
            out_flat = pl.pallas_call(
                kernel,
                out_shape=jax.ShapeDtypeStruct((B, CL), x.dtype),
                grid_spec=pltpu.PrefetchScalarGridSpec(
                    num_scalar_prefetch=0,
                    grid=grid,
                    in_specs=[
                        pl.BlockSpec((rows, CL), lambda b: (b, 0)),  # x (lane-dense)
                        pl.BlockSpec((CL, C), lambda b: (0, 0)),     # pool indicator
                        pl.BlockSpec((C, CL), lambda b: (0, 0)),     # bcast indicator
                        pl.BlockSpec((C, S), lambda b: (0, 0)),      # fc1 weight^T
                        pl.BlockSpec((1, S), lambda b: (0, 0)),      # fc1 bias
                        pl.BlockSpec((S, C), lambda b: (0, 0)),      # fc2 weight^T
                        pl.BlockSpec((1, C), lambda b: (0, 0)),      # fc2 bias
                    ],
                    out_specs=pl.BlockSpec((rows, CL), lambda b: (b, 0)),
                ),
                compiler_params=pltpu.CompilerParams(
                    dimension_semantics=("parallel",),
                    vmem_limit_bytes=vmem_limit),
                cost_estimate=cost,
            )(x_flat, pool, bcast, w1t, b1_2d, w2t, b2_2d)
            return out_flat.reshape(B, C, L)

    # ---- fallback: (TB, C, L) blocking (max pooling, L >= 128, or fold too big) ----
    row_bytes = _padded_bytes((C, L), itemsize)
    tile_budget = vmem_limit - fc_resident - (2 << 20)
    if block_b is None:
        rows = _pick_rows(B, row_bytes, tile_budget, per_buffer_cap,
                          n_live=_N_LIVE_TILES, min_steps=4, multiple=1)
        if rows is None:
            rows = 1   # TODO(synk): add L-tile grid axis for huge C*L instead
    else:
        rows = block_b
    rows = int(max(1, min(rows, B)))
    grid = (pl.cdiv(B, rows),)

    kernel = functools.partial(_se1d_ncl_kernel, setype=setype, inv_len=inv_len,
                               scale_activation=scale_activation)
    cost = pl.CostEstimate(
        flops=int(2 * B * CL + 4 * B * C * S + B * CL),
        transcendentals=int(B * C),
        bytes_accessed=int(2 * B * CL * itemsize + fc_resident))
    return pl.pallas_call(
        kernel,
        out_shape=jax.ShapeDtypeStruct((B, C, L), x.dtype),
        grid_spec=pltpu.PrefetchScalarGridSpec(
            num_scalar_prefetch=0,
            grid=grid,
            in_specs=[
                pl.BlockSpec((rows, C, L), lambda b: (b, 0, 0)),
                pl.BlockSpec((C, S), lambda b: (0, 0)),
                pl.BlockSpec((1, S), lambda b: (0, 0)),
                pl.BlockSpec((S, C), lambda b: (0, 0)),
                pl.BlockSpec((1, C), lambda b: (0, 0)),
            ],
            out_specs=pl.BlockSpec((rows, C, L), lambda b: (b, 0, 0)),
        ),
        compiler_params=pltpu.CompilerParams(
            dimension_semantics=("parallel",),
            vmem_limit_bytes=vmem_limit),
        cost_estimate=cost,
    )(x, w1t, b1_2d, w2t, b2_2d)


# ---------------------------------------------------------------------------
# pure-JAX reference and tests
# ---------------------------------------------------------------------------

def _reference(x, w1, b1, w2, b2, *, setype="avg"):
    xf = x.astype(jnp.float32)
    if setype == "avg":
        s = jnp.mean(xf, axis=-1, keepdims=True)                 # (B, C, 1)
    else:
        s = jnp.max(xf, axis=-1, keepdims=True)
    h = jnp.einsum("sc,bco->bso", w1, s) + b1[None, :, None]
    h = jnp.maximum(h, 0.0)
    z = jnp.einsum("cs,bso->bco", w2, h) + b2[None, :, None]
    scale = jax.nn.sigmoid(z)
    return (scale * xf).astype(x.dtype)


if __name__ == "__main__":
    key = jax.random.PRNGKey(0)

    def make_params(k, C, S):
        k1, k2, k3, k4 = jax.random.split(k, 4)
        lim1 = 1.0 / jnp.sqrt(jnp.float32(C))
        w1 = jax.random.uniform(k1, (S, C), jnp.float32, -lim1, lim1)
        b1 = jax.random.uniform(k2, (S,), jnp.float32, -lim1, lim1)
        lim2 = 1.0 / jnp.sqrt(jnp.float32(S))
        w2 = jax.random.uniform(k3, (C, S), jnp.float32, -lim2, lim2)
        b2 = jax.random.uniform(k4, (C,), jnp.float32, -lim2, lim2)
        return w1, b1, w2, b2

    TOL = dict(atol=1e-4, rtol=1e-4)

    # 1) avg pooling: lane-dense folded path, multi-step grid (B=32 -> 4 steps of 8).
    kx, kp, key = jax.random.split(key, 3)
    B, C, L, S = 32, 4, 16, 8
    x = jax.random.normal(kx, (B, C, L), dtype=jnp.float32)
    w1, b1, w2, b2 = make_params(kp, C, S)
    out = jax.block_until_ready(
        squeeze_excitation_1d(x, w1, b1, w2, b2, setype="avg"))
    ref = _reference(x, w1, b1, w2, b2, setype="avg")
    assert out.shape == (B, C, L)
    assert jnp.allclose(out, ref, **TOL), "avg (folded) mismatch"

    # 2) max pooling: NCL fallback path, multi-step grid.
    kx, key = jax.random.split(key)
    B = 8
    x = jax.random.normal(kx, (B, C, L), dtype=jnp.float32)
    out = jax.block_until_ready(
        squeeze_excitation_1d(x, w1, b1, w2, b2, setype="max"))
    ref = _reference(x, w1, b1, w2, b2, setype="max")
    assert jnp.allclose(out, ref, **TOL), "max mismatch"

    # 3) max pooling with all-negative inputs: padded lanes must not leak into the max.
    x_neg = -jnp.abs(x) - 1.0
    out = jax.block_until_ready(
        squeeze_excitation_1d(x_neg, w1, b1, w2, b2, setype="max"))
    ref = _reference(x_neg, w1, b1, w2, b2, setype="max")
    assert jnp.allclose(out, ref, **TOL), "max (all-negative) mismatch"

    # 4) avg pooling with L=130 (> 128, not a lane multiple): NCL fallback path;
    #    the mean must divide by the logical L, not the padded lane count.
    kx, kp, key = jax.random.split(key, 3)
    B, C, L, S = 8, 6, 130, 8
    x = jax.random.normal(kx, (B, C, L), dtype=jnp.float32)
    w1, b1, w2, b2 = make_params(kp, C, S)
    out = jax.block_until_ready(
        squeeze_excitation_1d(x, w1, b1, w2, b2, setype="avg"))
    ref = _reference(x, w1, b1, w2, b2, setype="avg")
    assert jnp.allclose(out, ref, **TOL), "avg (L=130, fallback) mismatch"

    print("KERNEL_OK")
</pallas_src>

<mosaic_0001>
module attributes {stable_mosaic.version = 11 : i64} {
  func.func @_se1d_folded_kernel(%arg0: i32, %arg1: memref<8x64xf32, #tpu.memory_space<vmem>>, %arg2: memref<64x4xf32, #tpu.memory_space<vmem>>, %arg3: memref<4x64xf32, #tpu.memory_space<vmem>>, %arg4: memref<4x8xf32, #tpu.memory_space<vmem>>, %arg5: memref<1x8xf32, #tpu.memory_space<vmem>>, %arg6: memref<8x4xf32, #tpu.memory_space<vmem>>, %arg7: memref<1x4xf32, #tpu.memory_space<vmem>>, %arg8: memref<8x64xf32, #tpu.memory_space<vmem>>) attributes {dimension_semantics = [#tpu.dimension_semantics<parallel>], iteration_bounds = array<i64: 4>, scalar_prefetch = 0 : i64, scratch_operands = 0 : i64, tpu.core_type = #tpu.core_type<tc>, window_params = [{transform_indices = @transform_0, window_bounds = array<i64: 8, 64>}, {pipeline_mode = #tpu.pipeline_mode<synchronous>, transform_indices = @transform_1, window_bounds = array<i64: 64, 4>}, {pipeline_mode = #tpu.pipeline_mode<synchronous>, transform_indices = @transform_2, window_bounds = array<i64: 4, 64>}, {pipeline_mode = #tpu.pipeline_mode<synchronous>, transform_indices = @transform_3, window_bounds = array<i64: 4, 8>}, {pipeline_mode = #tpu.pipeline_mode<synchronous>, transform_indices = @transform_4, window_bounds = array<i64: 1, 8>}, {pipeline_mode = #tpu.pipeline_mode<synchronous>, transform_indices = @transform_5, window_bounds = array<i64: 8, 4>}, {pipeline_mode = #tpu.pipeline_mode<synchronous>, transform_indices = @transform_6, window_bounds = array<i64: 1, 4>}, {transform_indices = @transform_7, window_bounds = array<i64: 8, 64>}]} {
    %c0 = arith.constant 0 : index
    %c0_0 = arith.constant 0 : index
    %0 = vector.load %arg1[%c0, %c0_0] : memref<8x64xf32, #tpu.memory_space<vmem>>, vector<8x64xf32>
    %c0_1 = arith.constant 0 : index
    %c0_2 = arith.constant 0 : index
    %1 = vector.load %arg2[%c0_1, %c0_2] : memref<64x4xf32, #tpu.memory_space<vmem>>, vector<64x4xf32>
    %cst = arith.constant dense<0.000000e+00> : vector<8x4xf32>
    %2 = tpu.matmul %0, %1, %cst {dimension_numbers = #tpu.dot_dimension_numbers<[1], [0], [0], [1], [0, 0, 1, 1], [], []>} : vector<8x64xf32>, vector<64x4xf32>, vector<8x4xf32> -> vector<8x4xf32>
    %cst_3 = arith.constant 6.250000e-02 : f32
    %3 = vector.broadcast %cst_3 : f32 to vector<8x4xf32>
    %4 = arith.mulf %2, %3 : vector<8x4xf32>
    %c0_4 = arith.constant 0 : index
    %c0_5 = arith.constant 0 : index
    %5 = vector.load %arg4[%c0_4, %c0_5] : memref<4x8xf32, #tpu.memory_space<vmem>>, vector<4x8xf32>
    %cst_6 = arith.constant dense<0.000000e+00> : vector<8x8xf32>
    %6 = tpu.matmul %4, %5, %cst_6 {dimension_numbers = #tpu.dot_dimension_numbers<[1], [0], [0], [1], [0, 0, 1, 1], [], []>} : vector<8x4xf32>, vector<4x8xf32>, vector<8x8xf32> -> vector<8x8xf32>
    %c0_7 = arith.constant 0 : index
    %c0_8 = arith.constant 0 : index
    %7 = vector.load %arg5[%c0_7, %c0_8] : memref<1x8xf32, #tpu.memory_space<vmem>>, vector<1x8xf32>
    %8 = vector.broadcast %7 : vector<1x8xf32> to vector<8x8xf32>
    %9 = arith.addf %6, %8 : vector<8x8xf32>
    %cst_9 = arith.constant 0.000000e+00 : f32
    %10 = vector.broadcast %cst_9 : f32 to vector<8x8xf32>
    %11 = arith.maximumf %9, %10 : vector<8x8xf32>
    %c0_10 = arith.constant 0 : index
    %c0_11 = arith.constant 0 : index
    %12 = vector.load %arg6[%c0_10, %c0_11] : memref<8x4xf32, #tpu.memory_space<vmem>>, vector<8x4xf32>
    %cst_12 = arith.constant dense<0.000000e+00> : vector<8x4xf32>
    %13 = tpu.matmul %11, %12, %cst_12 {dimension_numbers = #tpu.dot_dimension_numbers<[1], [0], [0], [1], [0, 0, 1, 1], [], []>} : vector<8x8xf32>, vector<8x4xf32>, vector<8x4xf32> -> vector<8x4xf32>
    %c0_13 = arith.constant 0 : index
    %c0_14 = arith.constant 0 : index
    %14 = vector.load %arg7[%c0_13, %c0_14] : memref<1x4xf32, #tpu.memory_space<vmem>>, vector<1x4xf32>
    %15 = vector.broadcast %14 : vector<1x4xf32> to vector<8x4xf32>
    %16 = arith.addf %13, %15 : vector<8x4xf32>
    %17 = arith.negf %16 : vector<8x4xf32>
    %18 = math.exp %17 : vector<8x4xf32>
    %cst_15 = arith.constant 1.000000e+00 : f32
    %19 = vector.broadcast %cst_15 : f32 to vector<8x4xf32>
    %20 = arith.addf %19, %18 : vector<8x4xf32>
    %21 = arith.divf %19, %20 : vector<8x4xf32>
    %c0_16 = arith.constant 0 : index
    %c0_17 = arith.constant 0 : index
    %22 = vector.load %arg3[%c0_16, %c0_17] : memref<4x64xf32, #tpu.memory_space<vmem>>, vector<4x64xf32>
    %cst_18 = arith.constant dense<0.000000e+00> : vector<8x64xf32>
    %23 = tpu.matmul %21, %22, %cst_18 {dimension_numbers = #tpu.dot_dimension_numbers<[1], [0], [0], [1], [0, 0, 1, 1], [], []>} : vector<8x4xf32>, vector<4x64xf32>, vector<8x64xf32> -> vector<8x64xf32>
    %24 = arith.mulf %0, %23 : vector<8x64xf32>
    %c0_19 = arith.constant 0 : index
    %c0_20 = arith.constant 0 : index
    %25 = vector.load %arg8[%c0_19, %c0_20] : memref<8x64xf32, #tpu.memory_space<vmem>>, vector<8x64xf32>
    tpu.vector_store %arg8[%c0_19, %c0_20], %24 {strides = array<i32>} : memref<8x64xf32, #tpu.memory_space<vmem>>, vector<8x64xf32>,
    return
  }
  func.func @transform_0(%arg0: i32) -> (i32, i32) {
    %c0_i32 = arith.constant 0 : i32
    %c0_i32_0 = arith.constant 0 : i32
    return %arg0, %c0_i32 : i32, i32
  }
  func.func @transform_1(%arg0: i32) -> (i32, i32) {
    %c0_i32 = arith.constant 0 : i32
    %c0_i32_0 = arith.constant 0 : i32
    %c0_i32_1 = arith.constant 0 : i32
    return %c0_i32, %c0_i32_0 : i32, i32
  }
  func.func @transform_2(%arg0: i32) -> (i32, i32) {
    %c0_i32 = arith.constant 0 : i32
    %c0_i32_0 = arith.constant 0 : i32
    %c0_i32_1 = arith.constant 0 : i32
    return %c0_i32, %c0_i32_0 : i32, i32
  }
  func.func @transform_3(%arg0: i32) -> (i32, i32) {
    %c0_i32 = arith.constant 0 : i32
    %c0_i32_0 = arith.constant 0 : i32
    %c0_i32_1 = arith.constant 0 : i32
    return %c0_i32, %c0_i32_0 : i32, i32
  }
  func.func @transform_4(%arg0: i32) -> (i32, i32) {
    %c0_i32 = arith.constant 0 : i32
    %c0_i32_0 = arith.constant 0 : i32
    %c0_i32_1 = arith.constant 0 : i32
    return %c0_i32, %c0_i32_0 : i32, i32
  }
  func.func @transform_5(%arg0: i32) -> (i32, i32) {
    %c0_i32 = arith.constant 0 : i32
    %c0_i32_0 = arith.constant 0 : i32
    %c0_i32_1 = arith.constant 0 : i32
    return %c0_i32, %c0_i32_0 : i32, i32
  }
  func.func @transform_6(%arg0: i32) -> (i32, i32) {
    %c0_i32 = arith.constant 0 : i32
    %c0_i32_0 = arith.constant 0 : i32
    %c0_i32_1 = arith.constant 0 : i32
    return %c0_i32, %c0_i32_0 : i32, i32
  }
  func.func @transform_7(%arg0: i32) -> (i32, i32) {
    %c0_i32 = arith.constant 0 : i32
    %c0_i32_0 = arith.constant 0 : i32
    return %arg0, %c0_i32 : i32, i32
  }
}

</mosaic_0001>

<bundles_post_ra>
// kernel: tpu_custom_call.1
= control target key start
LH: loop header
LB: loop body
LE: loop exit
PB: predicated region body
PF: predicated region fallthrough
CT: control target
= control target key end

     0   :  { %12 = vsyncpa [#allocation3], 0  ;;  %s788_s0 = inlined_call_operand.vmem [shape: f32[32,64], index: 0, kind: input, shape index: {}]   ;;  %s789_s1 = inlined_call_operand.vmem [shape: f32[64,4], index: 1, kind: input, shape index: {}]   ;;  %s790_s2 = inlined_call_operand.vmem [shape: f32[4,64], index: 2, kind: input, shape index: {}]   ;;  %s791_s3 = inlined_call_operand.vmem [shape: f32[4,8], index: 3, kind: input, shape index: {}]   ;;  %s792_s4 = inlined_call_operand.vmem [shape: f32[1,8], index: 4, kind: input, shape index: {}]   ;;  %s793_s5 = inlined_call_operand.vmem [shape: f32[8,4], index: 5, kind: input, shape index: {}]   ;;  %s794_s6 = inlined_call_operand.vmem [shape: f32[1,4], index: 6, kind: input, shape index: {}]   ;;  %s795_s7 = inlined_call_operand.hbm [shape: f32[32,64], index: 7, kind: output, shape index: {}]  }
   0x1   :  { %14 = vsyncpa [#allocation3 + $0x1], 0  ;;  %s660_s24 = smov 0   ;;  %s662_s25 = smov 0  }
   0x2   :  { %s664_s26 = smov 0   ;;  %s666_s27 = smov 0  }
   0x3 LB: > { %s681_s28 = sadd.s32 4294967295, %s618_s27   ;;  %s494_s29 = sadd.s32 4294967294, %s618_s27   ;;  %s618_s27 = sphi %s666_s27, %s801_s27   ;;  %s614_s26 = sphi %s664_s26, %s800_s26   ;;  %s610_s25 = sphi %s662_s25, %s799_s25   ;;  %s606_s24 = sphi %s660_s24, %s798_s24  }
   0x4   : > { %s685_s30 = sadd.s32 1, %s618_s27   ;;  %s179_s8 = sadd.s32 1, %s614_s26 }
   0x5   : > { %s176_s9 = ssub.s32 %s618_s27, %s685_s30  ;;  %p189_p0 = scmp.ne.s32.totalorder %s614_s26, %s610_s25 }
   0x6   : > { %p177_p1 = scmp.eq.s32.totalorder %s176_s9, 0  ;;  %p190_p2 = scmp.eq.s32.totalorder %s681_s28, 3 }
   0x7   : > { %p195_p3 = scmp.ne.s32.totalorder %s610_s25, %s606_s24  ;;  %p196_p4 = scmp.eq.s32.totalorder %s494_s29, 3 }
   0x8   : > { %s696_s10 = scalar_select %p177_p1, %s614_s26, %s179_s8  }
   0x9   : > { %p698_p5 = por %p190_p2, %p189_p0  ;;  %p702_p6 = por %p196_p4, %p195_p3 }
   0xa   : > { %p497_p7 = scmp.ge.s32.totalorder %s618_s27, 1  ;;  %p239_p8 = scmp.lt.s32.totalorder %s618_s27, 5 }
   0xc   : > { %p240_p9 = pnand %p497_p7, %p239_p8 }
   0xd   : > { %p270_p10 = scmp.lt.s32.totalorder (!%p240_p9), %s681_s28, 3  ;;  %s267_s16 = sand.u32 (!%p240_p9), 1, %s610_s25  }
   0xe   : > { %243 = sbr.rel (%p240_p9) target bundleno = 592 (0x250), region = 48  ;;  %s508_s18 = sshll.u32 (!%p240_p9), %s681_s28, 3 }
   0xf   : > { %s430_s21 = scalar_lea.hbm (!%p240_p9), %s795_s7, %s508_s18  ;;  %s420_s8 = scalar_lea.sflag (!%p240_p9), [#allocation3], %s267_s16 }
  0x10   : > { %s576_s15 = scalar_lea.hbm (!%p240_p9), %s795_s7, 32 }
  0x13   : > { %v282_v0 = vld [vmem:[%s789_s1 + $0x38] sm:$0xff]  ;;  %v281_v1 = vld [vmem:[%s789_s1 + $0x30] sm:$0xff]  ;;  %v280_v2 = vld [vmem:[%s789_s1 + $0x28] sm:$0xff]  ;;  %s271_s19 = scalar_select %p270_p10, %s681_s28, 3  ;;  %vm283_vm0 = vcmask 523264   ;;  %vm317_vm1 = vcmask 1043456  }
  0x14   : > { %295 = vmatpush.msra.mxu0 %v282_v0  ;;  %v279_v3 = vld [vmem:[%s789_s1 + $0x20] sm:$0xff]  ;;  %v278_v4 = vld [vmem:[%s789_s1 + $0x18] sm:$0xff]  ;;  %v277_v5 = vld [vmem:[%s789_s1 + $0x10] sm:$0xff]  ;;  %vm313_vm2 = vcmask 31744   ;;  %vm347_vm3 = vcmask 64512  }
  0x15   : > { %s499_s29 = sshll.u32 %s271_s19, 3  ;;  %v276_v6 = vld [vmem:[%s789_s1 + $0x8] sm:$0xff]  ;;  %v275_v7 = vld [vmem:[%s789_s1] sm:$0xff] }
  0x16   : > { %296 = vmatpush.msra.mxu0 %v281_v1  ;;  %s273_s17 = scalar_lea.vmem %s788_s0, %s499_s29  ;;  %v308_v9 = vld [vmem:[%s791_s3] sm:$0xf]  ;;  %s434_s29 = sshll.u32 %s430_s21, 4  ;;  %s435_s29 = int_to_ptr.hbm [resolvable:$true] %s434_s29 }
  0x17   : > { %v274_v8 = vld [vmem:[%s273_s17] sm:$0xff]  ;;  %501 = vmatpush.msk.msra.mxu1 %vm317_vm1, %v308_v9  ;;  %s498_s17 = sshll.u32 %s267_s16, 3  ;;  %s570_s9 = sshra.s32 %s435_s29, 4  ;;  %s571_s9 = int_to_ptr.hbm [resolvable:$true] %s570_s9 }
  0x18   : > { %297 = vmatpush.msra.mxu0 %v280_v2  ;;  %v342_v12 = vld [vmem:[%s793_s5] sm:$0xff]  ;;  %s269_s22 = scalar_lea.vmem [#allocation2], %s498_s17  ;;  %s572_s13 = scalar_lea.hbm %s571_s9, 8 }
  0x19   : > { %366 = vmatpush.msra.mxu2 %v342_v12  ;;  %v550_v13 = vld [vmem:[%s792_s4] ss:$0 sm:$0xff]  ;;  %s432_s23 = sshll.u32 %s269_s22, 4  ;;  %p573_p11 = scmp.ne.s32.totalorder %s571_s9, %s572_s13  ;;  %s433_s23 = int_to_ptr.vmem [resolvable:$true] %s432_s23 }
  0x1a   : > { %298 = vmatpush.msra.mxu0 %v279_v3  ;;  %v390_v17 = vld [vmem:[%s790_s2] sm:$0xf]  ;;  %p577_p0 = scmp.lt.s32.totalorder %s571_s9, %s795_s7  ;;  %p578_p1 = scmp.lt.s32.totalorder %s576_s15, %s572_s13 }
  0x1b   : > { %505 = vmatpush.msk.msra.mxu3 %vm317_vm1, %v390_v17  ;;  %v551_v18 = vld [vmem:[%s794_s6] ss:$0 sm:$0xff]  ;;  %p574_p12 = pnand %p573_p11, %p698_p5 }
  0x1c   : > { %299 = vmatpush.msra.mxu0 %v278_v4  ;;  %p579_p2 = por %p578_p1, %p577_p0 }
  0x1d   : > { %p575_p13 = pneg %p574_p12 }
  0x1e   : > { %300 = vmatpush.msra.mxu0 %v277_v5 }
  0x1f   : > { %p580_p3 = pnand %p579_p2, %p575_p13 }
  0x20   : > { %301 = vmatpush.msra.mxu0 %v276_v6 }
  0x22   : > { %302 = vmatpush.msra.mxu0 %v275_v7 }
  0x23   : > { %500 = vmatmul.msk.f32.vlgmr.msra.gmra.mxu0 %vm283_vm0, %v274_v8 }
  0xa0   : > { %v304_v10 = vpop.f32.mrf.mxu0 }
  0xa1   : > { %v307_v11 = vmul.f32 0.0625, %v304_v10 }
  0xa3   : > { %502 = vmatmul.msk.f32.vlgmr.msra.gmra.mxu1 %vm313_vm2, %v307_v11 }
 0x120   : > { %v338_v14 = vpop.f32.mrf.mxu1 }
 0x121   : > { %v339_v15 = vadd.f32 %v550_v13, %v338_v14 }
 0x123   : > { %v341_v16 = vmax.f32 %v339_v15, 0.0 }
 0x125   : > { %503 = vmatmul.msk.f32.vlgmr.msra.gmra.mxu2 %vm347_vm3, %v341_v16 }
 0x1a8   : > { %v368_v19 = vpop.f32.mrf.mxu2 }
 0x1a9   : > { %v369_v20 = vadd.f32 %v551_v18, %v368_v19 }
 0x1ab   : > { %v504_v21 = vmul.f32 -1.442695, %v369_v20 }
 0x1ad   : > { %552 = vpow2.f32 %v504_v21 }
 0x1b3   : > { %v553_v22 = vpop.eup %552 }
 0x1b4   : > { %v374_v23 = vadd.f32 1.0, %v553_v22 }
 0x1b6   : > { %554 = vrcp.f32 %v374_v23  ;;  %v386_v27 = vand.u32 2147483648, %v374_v23  ;;  %v384_v29 = vand.u32 2147483647, %v374_v23  ;;  %vm380_vm5 = vweird.f32 %v374_v23 }
 0x1b8   : > { %v387_v31 = vor.u32 1.1754944e-38, %v386_v27  ;;  %vm385_vm7 = vcmp.eq.f32.partialorder %v384_v29, 8.507059e+37 }
 0x1bc   : > { %v555_v24 = vpop.eup %554 }
 0x1bd   : > { %v376_v25 = vmul.f32 %v555_v24, %v374_v23  ;;  %vm381_vm4 = vweird.f32 %v555_v24 }
 0x1be   : > { %vm382_vm6 = vmor %vm380_vm5, %vm381_vm4 }
 0x1bf   : > { %v377_v26 = vsub.f32 1.0, %v376_v25 }
 0x1c1   : > { %v378_v28 = vmul.f32 %v555_v24, %v377_v26 }
 0x1c3   : > { %v379_v30 = vadd.f32 %v555_v24, %v378_v28 }
 0x1c5   : > { %v383_v32 = vsel %vm382_vm6, %v555_v24, %v379_v30 }
 0x1c6   : > { %v388_v33 = vsel %vm385_vm7, %v387_v31, %v383_v32 }
 0x1c7   : > { %506 = vmatmul.msk.f32.vlgmr.msra.gmra.mxu3 %vm313_vm2, %v388_v33 }
 0x24a   : > { %v414_v34 = vpop.f32.mrf.mxu3 }
 0x24b   : > { %v417_v35 = vmul.f32 %v414_v34, %v274_v8 }
 0x24d   : > { %418 = vst.msk [vmem:[%s269_s22] sm:$0xff] %vm283_vm0, %v417_v35 }
 0x24e   : > { %583 = shalt.err (!%p580_p3)
}
 0x24f   : > { %511 = dma.vmem_to_hbm [thread:$0]  (%p698_p5), %s433_s23, 128, %s435_s29, %s420_s8  }
 0x250 PF: > { %p517_p4 = scmp.ge.s32.totalorder %s618_s27, 2  ;;  %s446_s16 = sand.u32 1, %s606_s24  }
 0x251   : > { %s447_s20 = scalar_lea.sflag [#allocation3], %s446_s16 }
 0x252   : > { %p514_p7 = pnand %p517_p4, %p702_p6 }
 0x254   : > { %p515_p8 = pneg %p514_p7 }
 0x256   : > { %601 = dma.done.wait (%p515_p8), %s447_s20, 128  }
 0x257   : > { %603 = vsyncadd (%p515_p8), %s447_s20, 4294967168  ;;  %p17_p9 = scmp.ge.s32.totalorder %s685_s30, 6   ;;  %s798_s24 = smov %s610_s25 }
 0x258   : > { %s799_s25 = smov %s614_s26  ;;  %s800_s26 = smov %s696_s10 }
 0x259   : > { %s801_s27 = smov %s685_s30  ;;  %19 = sbr.rel (!%p17_p9) target bundleno = 3 (0x3), region = 83 }
 0x25e   :  { %453 = vsyncpa [#allocation3], 1 }
 0x25f   :  { %455 = vsyncpa [#allocation3 + $0x1], 1 }

</bundles_post_ra>
